<compile_context>
chip_gen: v6e
topology: v6e:2x2x1
jax: 0.10.0
libtpu: 0.0.40
codegen_flags: <defaults>
</compile_context>

<pallas_src>
import functools

import jax
import jax.numpy as jnp
from jax import lax
from jax.experimental import pallas as pl
from jax.experimental.pallas import tpu as pltpu

_VMEM_LIMIT = 32 * 1024 * 1024  # explicit, safe on v5e/v6e/v7x


# --------------------------------------------------------------------------
# Projection kernel: proj = x @ W_cat + b_cat      (W_cat = [W_src | W_dst])
# --------------------------------------------------------------------------
def _proj_kernel(x_ref, w_ref, b_ref, o_ref):
    x = x_ref[...].astype(jnp.bfloat16)          # cast only at the MXU boundary
    w = w_ref[...].astype(jnp.bfloat16)
    acc = jnp.dot(x, w, preferred_element_type=jnp.float32)
    o_ref[...] = (acc + b_ref[...]).astype(o_ref.dtype)


def _project(x, w_cat, b_cat, *, row_tile):
    n, fin = x.shape
    fout = w_cat.shape[1]
    return pl.pallas_call(
        _proj_kernel,
        out_shape=jax.ShapeDtypeStruct((n, fout), jnp.float32),
        grid_spec=pltpu.PrefetchScalarGridSpec(
            num_scalar_prefetch=0,
            grid=(n // row_tile,),
            in_specs=[
                pl.BlockSpec((row_tile, fin), lambda i: (i, 0)),
                pl.BlockSpec((fin, fout), lambda i: (0, 0)),
                pl.BlockSpec((1, fout), lambda i: (0, 0)),
            ],
            out_specs=pl.BlockSpec((row_tile, fout), lambda i: (i, 0)),
        ),
        compiler_params=pltpu.CompilerParams(
            dimension_semantics=("parallel",),
            vmem_limit_bytes=_VMEM_LIMIT),
    )(x, w_cat, b_cat)


# --------------------------------------------------------------------------
# Attention kernel: grid = (dst_tiles, heads, src_tiles), online softmax.
# --------------------------------------------------------------------------
def _gatv2_attn_kernel(fs_t_ref, fd_ref, a_ref, adj_ref, out_ref,
                       m_sc, l_sc, acc_sc, *,
                       num_heads, out_feats, negative_slope, apply_elu):
    hd = pl.program_id(1)
    k = pl.program_id(2)
    nk = pl.num_programs(2)

    @pl.when(k == 0)
    def _init():
        m_sc[...] = jnp.full_like(m_sc, -1e30)
        l_sc[...] = jnp.zeros_like(l_sc)
        acc_sc[...] = jnp.zeros_like(acc_sc)

    fs_t = fs_t_ref[...]                       # (D, T_src)  src feats, node axis on lanes
    fd = fd_ref[...]                           # (T_dst, D)  dst feats
    a = a_ref[...]                             # (1, D)      attention vector (this head)
    mask = adj_ref[...].astype(jnp.float32) > 0.0   # (T_dst, T_src)

    slope = negative_slope
    # leaky_relu(x) = slope*x + (1-slope)*relu(x)
    # linear part: rank-1 outer sum of two tiny matvecs.
    s_src = jnp.dot(a, fs_t, preferred_element_type=jnp.float32)          # (1, T_src)
    s_dst = lax.dot_general(fd, a, (((1,), (1,)), ((), ())),
                            preferred_element_type=jnp.float32)           # (T_dst, 1)
    e = slope * (s_dst + s_src)                                           # (T_dst, T_src)

    # relu part: lane-dense (T_dst, T_src) accumulation over the small dim D.
    a_relu = (1.0 - slope) * a                                            # (1, D)
    for d in range(out_feats):
        x = fd[:, d:d + 1] + fs_t[d:d + 1, :]                             # (T_dst, T_src)
        e = e + a_relu[:, d:d + 1] * jnp.maximum(x, 0.0)

    # masked online softmax over incoming edges of each dst row.
    e = jnp.where(mask, e, -1e30)
    m_prev = m_sc[...]
    m_new = jnp.maximum(m_prev, jnp.max(e, axis=1, keepdims=True))        # (T_dst, 1)
    p = jnp.where(mask, jnp.exp(e - m_new), 0.0)                          # (T_dst, T_src)
    corr = jnp.exp(m_prev - m_new)                                        # (T_dst, 1)
    l_sc[...] = corr * l_sc[...] + jnp.sum(p, axis=1, keepdims=True)
    # aggregation: acc += p @ fs  (contract the src axis; bf16 in, f32 acc)
    acc_sc[...] = corr * acc_sc[...] + lax.dot_general(
        p.astype(jnp.bfloat16), fs_t.astype(jnp.bfloat16),
        (((1,), (1,)), ((), ())), preferred_element_type=jnp.float32)     # (T_dst, D)
    m_sc[...] = m_new

    @pl.when(k == nk - 1)
    def _finalize():
        l = l_sc[...]
        # zero-in-degree guard: l == 0 -> output 0 (matches sum over no edges)
        inv_l = pl.reciprocal(jnp.where(l > 0.0, l, 1.0), approx=True)
        out_val = acc_sc[...] * inv_l                                     # (T_dst, D)
        if apply_elu:
            out_val = jnp.where(out_val > 0.0, out_val, jnp.expm1(out_val))
        out_val = out_val.astype(out_ref.dtype)
        # Static per-head column slab into the (T_dst, H*D) resident output
        # block (written back to HBM once per dst tile).
        for h_s in range(num_heads):
            @pl.when(hd == h_s)
            def _store(h_s=h_s, out_val=out_val):
                lo = h_s * out_feats
                out_ref[:, lo:lo + out_feats] = out_val


# --------------------------------------------------------------------------
# One GATv2Conv layer
# --------------------------------------------------------------------------
def gatv2_layer(h, adj_mask, W_src, b_src, W_dst, b_dst, attn, *,
                num_heads, out_feats, negative_slope=0.2, apply_elu=False):
    N = h.shape[0]
    HD = num_heads * out_feats

    dst_tile = N if N <= 128 else 128
    src_tile = N if N <= 128 else 128      # lane axis: multiple of 128 or == N
    assert N % dst_tile == 0 and N % src_tile == 0

    # fused projection: one wide matmul instead of two narrow ones.
    w_cat = jnp.concatenate([W_src, W_dst], axis=1)      # (Fin, 2*H*D)
    b_cat = jnp.concatenate([b_src, b_dst], axis=1)      # (1, 2*H*D)
    proj = _project(h, w_cat, b_cat, row_tile=dst_tile)  # (N, 2*H*D) f32
    fs_all = proj[:, :HD]
    fd_all = proj[:, HD:]

    # layout plumbing (outside the kernel): src features per head with the
    # node axis LAST (lane-dense), dst features per head with features last.
    fs_t = fs_all.reshape(N, num_heads, out_feats).transpose(1, 2, 0)  # (H, D, N)
    fd_h = fd_all.reshape(N, num_heads, out_feats).transpose(1, 0, 2)  # (H, N, D)
    attn_r = attn.reshape(num_heads, 1, out_feats)                     # (H, 1, D)

    kernel = functools.partial(
        _gatv2_attn_kernel, num_heads=num_heads, out_feats=out_feats,
        negative_slope=negative_slope, apply_elu=apply_elu)

    grid = (N // dst_tile, num_heads, N // src_tile)
    return pl.pallas_call(
        kernel,
        out_shape=jax.ShapeDtypeStruct((N, HD), jnp.float32),
        grid_spec=pltpu.PrefetchScalarGridSpec(
            num_scalar_prefetch=0,
            grid=grid,
            in_specs=[
                pl.BlockSpec((None, out_feats, src_tile), lambda i, h, k: (h, 0, k)),
                pl.BlockSpec((None, dst_tile, out_feats), lambda i, h, k: (h, i, 0)),
                pl.BlockSpec((None, 1, out_feats), lambda i, h, k: (h, 0, 0)),
                pl.BlockSpec((dst_tile, src_tile), lambda i, h, k: (i, k)),
            ],
            out_specs=pl.BlockSpec((dst_tile, HD), lambda i, h, k: (i, 0)),
            scratch_shapes=[
                pltpu.VMEM((dst_tile, 1), jnp.float32),          # running max m
                pltpu.VMEM((dst_tile, 1), jnp.float32),          # running denom l
                pltpu.VMEM((dst_tile, out_feats), jnp.float32),  # running acc
            ],
        ),
        compiler_params=pltpu.CompilerParams(
            dimension_semantics=("parallel", "arbitrary", "arbitrary"),
            vmem_limit_bytes=_VMEM_LIMIT),
    )(fs_t, fd_h, attn_r, adj_mask)


# --------------------------------------------------------------------------
# Parameters + full forward (layer1 -> ELU -> flatten -> layer2 -> mean(1))
# --------------------------------------------------------------------------
def init_params(key, in_dim, hidden_dim, out_dim, num_heads):
    ks = jax.random.split(key, 6)
    s = 0.1

    def lin(k, fi, fo):
        return s * jax.random.normal(k, (fi, fo), jnp.float32)

    return {
        "l1": {
            "W_src": lin(ks[0], in_dim, hidden_dim * num_heads),
            "b_src": jnp.zeros((1, hidden_dim * num_heads), jnp.float32),
            "W_dst": lin(ks[1], in_dim, hidden_dim * num_heads),
            "b_dst": jnp.zeros((1, hidden_dim * num_heads), jnp.float32),
            "attn": s * jax.random.normal(ks[2], (num_heads, hidden_dim), jnp.float32),
        },
        "l2": {
            "W_src": lin(ks[3], hidden_dim * num_heads, out_dim),
            "b_src": jnp.zeros((1, out_dim), jnp.float32),
            "W_dst": lin(ks[4], hidden_dim * num_heads, out_dim),
            "b_dst": jnp.zeros((1, out_dim), jnp.float32),
            "attn": s * jax.random.normal(ks[5], (1, out_dim), jnp.float32),
        },
    }


def gatv2_forward(params, adj, h, *, hidden_dim, out_dim, num_heads):
    adj_mask = adj.astype(jnp.bfloat16)   # halve HBM traffic for the N x N mask
    p1, p2 = params["l1"], params["l2"]
    # layer1 -> ELU -> flatten(1): output columns are head-major == flatten(1)
    h1 = gatv2_layer(h, adj_mask, p1["W_src"], p1["b_src"], p1["W_dst"], p1["b_dst"],
                     p1["attn"], num_heads=num_heads, out_feats=hidden_dim,
                     apply_elu=True)                                  # (N, H*hidden)
    # layer2 (1 head); mean over the single head dim is a no-op
    h2 = gatv2_layer(h1, adj_mask, p2["W_src"], p2["b_src"], p2["W_dst"], p2["b_dst"],
                     p2["attn"], num_heads=1, out_feats=out_dim,
                     apply_elu=False)                                 # (N, out_dim)
    return h2


if __name__ == "__main__":
    N = 256          # nodes (2 dst tiles x 2 src tiles -> exercises online softmax)
    in_dim = 32
    hidden_dim = 8
    out_dim = 8
    num_heads = 4

    key = jax.random.PRNGKey(0)
    k_feat, k_adj, k_par = jax.random.split(key, 3)

    h = jax.random.normal(k_feat, (N, in_dim), jnp.float32)

    # deterministic random graph with self-loops (every dst has >=1 in-edge)
    adj = jax.random.bernoulli(k_adj, 0.05, (N, N)).astype(jnp.float32)
    adj = jnp.maximum(adj, jnp.eye(N, dtype=jnp.float32))

    params = init_params(k_par, in_dim, hidden_dim, out_dim, num_heads)

    out = gatv2_forward(params, adj, h,
                        hidden_dim=hidden_dim, out_dim=out_dim,
                        num_heads=num_heads)
    out = jax.block_until_ready(out)
    assert out.shape == (N, out_dim)
    assert bool(jnp.all(jnp.isfinite(out)))
    print("KERNEL_OK")
</pallas_src>

<mosaic_0001>
module attributes {stable_mosaic.version = 11 : i64} {
  func.func @_proj_kernel(%arg0: i32, %arg1: memref<128x32xf32, #tpu.memory_space<vmem>>, %arg2: memref<32x64xf32, #tpu.memory_space<vmem>>, %arg3: memref<1x64xf32, #tpu.memory_space<vmem>>, %arg4: memref<128x64xf32, #tpu.memory_space<vmem>>) attributes {dimension_semantics = [#tpu.dimension_semantics<parallel>], iteration_bounds = array<i64: 2>, scalar_prefetch = 0 : i64, scratch_operands = 0 : i64, tpu.core_type = #tpu.core_type<tc>, window_params = [{transform_indices = @transform_0, window_bounds = array<i64: 128, 32>}, {pipeline_mode = #tpu.pipeline_mode<synchronous>, transform_indices = @transform_1, window_bounds = array<i64: 32, 64>}, {pipeline_mode = #tpu.pipeline_mode<synchronous>, transform_indices = @transform_2, window_bounds = array<i64: 1, 64>}, {transform_indices = @transform_3, window_bounds = array<i64: 128, 64>}]} {
    %c0 = arith.constant 0 : index
    %c0_0 = arith.constant 0 : index
    %0 = vector.load %arg1[%c0, %c0_0] : memref<128x32xf32, #tpu.memory_space<vmem>>, vector<128x32xf32>
    %1 = arith.truncf %0 : vector<128x32xf32> to vector<128x32xbf16>
    %c0_1 = arith.constant 0 : index
    %c0_2 = arith.constant 0 : index
    %2 = vector.load %arg2[%c0_1, %c0_2] : memref<32x64xf32, #tpu.memory_space<vmem>>, vector<32x64xf32>
    %3 = arith.truncf %2 : vector<32x64xf32> to vector<32x64xbf16>
    %cst = arith.constant dense<0.000000e+00> : vector<128x64xf32>
    %4 = tpu.matmul %1, %3, %cst {dimension_numbers = #tpu.dot_dimension_numbers<[1], [0], [0], [1], [0, 0, 1, 1], [], []>} : vector<128x32xbf16>, vector<32x64xbf16>, vector<128x64xf32> -> vector<128x64xf32>
    %c0_3 = arith.constant 0 : index
    %c0_4 = arith.constant 0 : index
    %5 = vector.load %arg3[%c0_3, %c0_4] : memref<1x64xf32, #tpu.memory_space<vmem>>, vector<1x64xf32>
    %6 = vector.broadcast %5 : vector<1x64xf32> to vector<128x64xf32>
    %7 = arith.addf %4, %6 : vector<128x64xf32>
    %c0_5 = arith.constant 0 : index
    %c0_6 = arith.constant 0 : index
    %8 = vector.load %arg4[%c0_5, %c0_6] : memref<128x64xf32, #tpu.memory_space<vmem>>, vector<128x64xf32>
    tpu.vector_store %arg4[%c0_5, %c0_6], %7 {strides = array<i32>} : memref<128x64xf32, #tpu.memory_space<vmem>>, vector<128x64xf32>,
    return
  }
  func.func @transform_0(%arg0: i32) -> (i32, i32) {
    %c0_i32 = arith.constant 0 : i32
    %c0_i32_0 = arith.constant 0 : i32
    return %arg0, %c0_i32 : i32, i32
  }
  func.func @transform_1(%arg0: i32) -> (i32, i32) {
    %c0_i32 = arith.constant 0 : i32
    %c0_i32_0 = arith.constant 0 : i32
    %c0_i32_1 = arith.constant 0 : i32
    return %c0_i32, %c0_i32_0 : i32, i32
  }
  func.func @transform_2(%arg0: i32) -> (i32, i32) {
    %c0_i32 = arith.constant 0 : i32
    %c0_i32_0 = arith.constant 0 : i32
    %c0_i32_1 = arith.constant 0 : i32
    return %c0_i32, %c0_i32_0 : i32, i32
  }
  func.func @transform_3(%arg0: i32) -> (i32, i32) {
    %c0_i32 = arith.constant 0 : i32
    %c0_i32_0 = arith.constant 0 : i32
    return %arg0, %c0_i32 : i32, i32
  }
}

</mosaic_0001>

<bundles_post_ra>
// kernel: tpu_custom_call.1
= control target key start
LH: loop header
LB: loop body
LE: loop exit
PB: predicated region body
PF: predicated region fallthrough
CT: control target
= control target key end

     0   :  { %s497_s12 = smov 0   ;;  %s596_s0 = inlined_call_operand.vmem [shape: f32[256,32], index: 0, kind: input, shape index: {}]   ;;  %s597_s1 = inlined_call_operand.vmem [shape: f32[32,64], index: 1, kind: input, shape index: {}]   ;;  %s598_s2 = inlined_call_operand.vmem [shape: f32[1,64], index: 2, kind: input, shape index: {}]   ;;  %s599_s3 = inlined_call_operand.vmem [shape: f32[256,64], index: 3, kind: output, shape index: {}]  }
   0x1 LB: > { %s407_s13 = sadd.s32 4294967295, %s475_s12   ;;  %p411_p0 = scmp.ge.s32.totalorder %s475_s12, 1  ;;  %s475_s12 = sphi %s497_s12, %s13_s12  }
   0x2   : > { %p138_p1 = scmp.lt.s32.totalorder %s475_s12, 3 }
   0x4   : > { %p139_p2 = pnand %p411_p0, %p138_p1 }
   0x5   : > { %s412_s20 = sshll.u32 (!%p139_p2), %s407_s13, 4 }
   0x6   : > { %142 = sbr.rel (%p139_p2) target bundleno = 232 (0xe8), region = 32  ;;  %p163_p3 = scmp.lt.s32.totalorder (!%p139_p2), %s412_s20, 31 }
   0xb   : > { %v201_v0 = vld [vmem:[%s597_s1 + $0x10] sm:$0xff]  ;;  %v202_v1 = vld [vmem:[%s597_s1 + $0x18] sm:$0xff]  ;;  %v199_v2 = vld [vmem:[%s597_s1] sm:$0xff]  ;;  %s601_s20 = smov (!%p163_p3, %s412_s20), 31  ;;  %vm212_vm0 = vcmask 261120   ;;  %vm334_vm1 = vcmask 523264  }
   0xc   : > { %v204_v3 = vpack.c.bf16 %v202_v1, %v201_v0  ;;  %v200_v4 = vld [vmem:[%s597_s1 + $0x8] sm:$0xff]  ;;  %s413_s23 = sshll.u32 %s601_s20, 3  ;;  %v416_v30 = vld [vmem:[%s598_s2] ss:$0 sm:$0xff] }
   0xd   : > { %v203_v5 = vpack.c.bf16 %v200_v4, %v199_v2  ;;  %s525_s26 = scalar_lea.vmem %s596_s0, %s413_s23  ;;  %s559_s4 = scalar_lea.vmem %s599_s3, %s413_s23 }
   0xe   : > { %437 = vmatprep.subr.bf16.mxu0 %v204_v3  ;;  %457 = vmatprep.subr.bf16.mxu1 %v204_v3  ;;  %v175_v6 = vld [vmem:[%s525_s26] sm:$0xff]  ;;  %v176_v7 = vld [vmem:[%s525_s26 + $0x8] sm:$0xff]  ;;  %v177_v11 = vld [vmem:[%s525_s26 + $0x10] sm:$0xff] }
   0xf   : > { %438 = vmatpush3.bf16.msra.mxu0 %v204_v3  ;;  %459 = vmatpush3.bf16.msra.mxu1 %v204_v3  ;;  %v183_v8 = vld [vmem:[%s525_s26 + $0x40] sm:$0xff]  ;;  %v191_v9 = vpack.c.bf16 %v176_v7, %v175_v6  ;;  %v184_v10 = vld [vmem:[%s525_s26 + $0x48] sm:$0xff]  ;;  %v178_v12 = vld [vmem:[%s525_s26 + $0x18] sm:$0xff] }
  0x10   : > { %439 = vmatprep.subr.bf16.mxu0 %v203_v5  ;;  %458 = vmatprep.subr.bf16.mxu1 %v203_v5  ;;  %v195_v13 = vpack.c.bf16 %v184_v10, %v183_v8  ;;  %v192_v14 = vpack.c.bf16 %v178_v12, %v177_v11  ;;  %v185_v15 = vld [vmem:[%s525_s26 + $0x50] sm:$0xff]  ;;  %v186_v16 = vld [vmem:[%s525_s26 + $0x58] sm:$0xff]  ;;  %v179_v17 = vld [vmem:[%s525_s26 + $0x20] sm:$0xff] }
  0x11   : > { %441 = vmatprep.mubr.msk.bf16.mxu0 %vm212_vm0, %v191_v9  ;;  %v196_v18 = vpack.c.bf16 %v186_v16, %v185_v15  ;;  %v180_v19 = vld [vmem:[%s525_s26 + $0x28] sm:$0xff]  ;;  %v187_v20 = vld [vmem:[%s525_s26 + $0x60] sm:$0xff]  ;;  %v181_v24 = vld [vmem:[%s525_s26 + $0x30] sm:$0xff] }
  0x12   : > { %v188_v21 = vld [vmem:[%s525_s26 + $0x68] sm:$0xff]  ;;  %449 = vmatprep.mubr.msk.bf16.mxu1 %vm212_vm0, %v195_v13  ;;  %v193_v22 = vpack.c.bf16 %v180_v19, %v179_v17  ;;  %v182_v25 = vld [vmem:[%s525_s26 + $0x38] sm:$0xff]  ;;  %v189_v26 = vld [vmem:[%s525_s26 + $0x70] sm:$0xff] }
  0x13   : > { %440 = vmatpush3.bf16.msra.mxu0 %v203_v5  ;;  %460 = vmatpush3.bf16.msra.mxu1 %v203_v5  ;;  %v197_v23 = vpack.c.bf16 %v188_v21, %v187_v20  ;;  %v190_v27 = vld [vmem:[%s525_s26 + $0x78] sm:$0xff]  ;;  %v194_v28 = vpack.c.bf16 %v182_v25, %v181_v24 }
  0x14   : > { %v198_v29 = vpack.c.bf16 %v190_v27, %v189_v26 }
  0x16   : > { %442 = vmatmul.mubr.msk.bf16.vlgmr.msra.gmra.mxu0 %vm212_vm0, %v192_v14  ;;  %450 = vmatmul.mubr.msk.bf16.vlgmr.msra.gmra.mxu1 %vm212_vm0, %v196_v18 }
  0x17   : > { %445 = vmatprep.mubr.msk.bf16.mxu0 %vm212_vm0, %v193_v22  ;;  %453 = vmatprep.mubr.msk.bf16.mxu1 %vm212_vm0, %v197_v23 }
  0x1e   : > { %446 = vmatmul.mubr.msk.bf16.gmra.mxu0 %vm212_vm0, %v194_v28  ;;  %454 = vmatmul.mubr.msk.bf16.gmra.mxu1 %vm212_vm0, %v198_v29 }
  0xd6   : > { %v443_v31 = vpop.f32.mrf.mxu0  ;;  %v451_v33 = vpop.f32.mrf.mxu1 }
  0xd7   : > { %v280_v32 = vadd.f32 %v443_v31, %v416_v30  ;;  %v312_v34 = vadd.f32 %v451_v33, %v416_v30 }
  0xd8   : > { %v271_v35 = vpop.f32.mrf.mxu0  ;;  %v303_v37 = vpop.f32.mrf.mxu1 }
  0xd9   : > { %337 = vst.msk [vmem:[%s559_s4 + $0x10] sm:$0xff] %vm334_vm1, %v280_v32  ;;  %v272_v36 = vadd.f32 %v416_v30, %v271_v35  ;;  %345 = vst.msk [vmem:[%s559_s4 + $0x50] sm:$0xff] %vm334_vm1, %v312_v34  ;;  %v304_v38 = vadd.f32 %v416_v30, %v303_v37 }
  0xda   : > { %v444_v39 = vpop.f32.mrf.mxu0  ;;  %v452_v41 = vpop.f32.mrf.mxu1 }
  0xdb   : > { %335 = vst.msk [vmem:[%s559_s4] sm:$0xff] %vm334_vm1, %v272_v36  ;;  %v283_v40 = vadd.f32 %v444_v39, %v416_v30  ;;  %343 = vst.msk [vmem:[%s559_s4 + $0x40] sm:$0xff] %vm334_vm1, %v304_v38  ;;  %v315_v42 = vadd.f32 %v452_v41, %v416_v30 }
  0xdc   : > { %v274_v43 = vpop.f32.mrf.mxu0  ;;  %v306_v45 = vpop.f32.mrf.mxu1 }
  0xdd   : > { %338 = vst.msk [vmem:[%s559_s4 + $0x18] sm:$0xff] %vm334_vm1, %v283_v40  ;;  %v275_v44 = vadd.f32 %v416_v30, %v274_v43  ;;  %346 = vst.msk [vmem:[%s559_s4 + $0x58] sm:$0xff] %vm334_vm1, %v315_v42  ;;  %v307_v46 = vadd.f32 %v416_v30, %v306_v45 }
  0xde   : > { %v447_v47 = vpop.f32.mrf.mxu0  ;;  %v455_v49 = vpop.f32.mrf.mxu1 }
  0xdf   : > { %336 = vst.msk [vmem:[%s559_s4 + $0x8] sm:$0xff] %vm334_vm1, %v275_v44  ;;  %v296_v48 = vadd.f32 %v447_v47, %v416_v30  ;;  %344 = vst.msk [vmem:[%s559_s4 + $0x48] sm:$0xff] %vm334_vm1, %v307_v46  ;;  %v328_v50 = vadd.f32 %v455_v49, %v416_v30 }
  0xe0   : > { %v287_v51 = vpop.f32.mrf.mxu0  ;;  %v319_v53 = vpop.f32.mrf.mxu1 }
  0xe1   : > { %341 = vst.msk [vmem:[%s559_s4 + $0x30] sm:$0xff] %vm334_vm1, %v296_v48  ;;  %v288_v52 = vadd.f32 %v416_v30, %v287_v51  ;;  %349 = vst.msk [vmem:[%s559_s4 + $0x70] sm:$0xff] %vm334_vm1, %v328_v50  ;;  %v320_v54 = vadd.f32 %v416_v30, %v319_v53 }
  0xe2   : > { %v448_v55 = vpop.f32.mrf.mxu0  ;;  %v456_v57 = vpop.f32.mrf.mxu1 }
  0xe3   : > { %339 = vst.msk [vmem:[%s559_s4 + $0x20] sm:$0xff] %vm334_vm1, %v288_v52  ;;  %v299_v56 = vadd.f32 %v448_v55, %v416_v30  ;;  %347 = vst.msk [vmem:[%s559_s4 + $0x60] sm:$0xff] %vm334_vm1, %v320_v54  ;;  %v331_v58 = vadd.f32 %v456_v57, %v416_v30 }
  0xe4   : > { %v290_v59 = vpop.f32.mrf.mxu0  ;;  %v322_v61 = vpop.f32.mrf.mxu1 }
  0xe5   : > { %342 = vst.msk [vmem:[%s559_s4 + $0x38] sm:$0xff] %vm334_vm1, %v299_v56  ;;  %v291_v60 = vadd.f32 %v416_v30, %v290_v59  ;;  %350 = vst.msk [vmem:[%s559_s4 + $0x78] sm:$0xff] %vm334_vm1, %v331_v58  ;;  %v323_v62 = vadd.f32 %v416_v30, %v322_v61 }
  0xe7   : > { %340 = vst.msk [vmem:[%s559_s4 + $0x28] sm:$0xff] %vm334_vm1, %v291_v60  ;;  %348 = vst.msk [vmem:[%s559_s4 + $0x68] sm:$0xff] %vm334_vm1, %v323_v62 }
  0xe8 PF: > { %s13_s12 = sadd.s32 1, %s475_s12  }
  0xe9   : > { %p10_p4 = scmp.ge.s32.totalorder %s13_s12, 4  }
  0xeb   :  { %12 = sbr.rel (!%p10_p4) target bundleno = 1 (0x1), region = 62 }

</bundles_post_ra>
